<compile_context>
chip_gen: v5e
topology: v5e:2x2
jax: 0.10.0
libtpu: 0.0.40
codegen_flags: <defaults>
</compile_context>

<pallas_src>
import functools

import jax
import jax.numpy as jnp
from jax.experimental import pallas as pl
from jax.experimental.pallas import tpu as pltpu


def _cross_attention_kernel(q_ref, kv_ref,
                            wq_ref, bq_ref,
                            wk_ref, bk_ref,
                            wv_ref, bv_ref,
                            wo_ref, bo_ref,
                            o_ref,
                            k_scratch, v_scratch, ctx_scratch,
                            *, num_heads):
    bblk, tq, dq = q_ref.shape
    _, s2, dkv = kv_ref.shape
    d_out = wq_ref.shape[1]
    dh = d_out // num_heads
    cdt = jnp.bfloat16  # MXU operand dtype; accumulation / softmax stay f32

    # ---- K/V projections: computed once per batch-block (first q-tile) and
    #      cached in bf16 VMEM scratch; later q-tiles reuse them. ----
    @pl.when(pl.program_id(1) == 0)
    def _():
        kv_in = kv_ref[...].reshape(bblk * s2, dkv).astype(cdt)
        k = jnp.dot(kv_in, wk_ref[...],
                    preferred_element_type=jnp.float32) + bk_ref[...]
        v = jnp.dot(kv_in, wv_ref[...],
                    preferred_element_type=jnp.float32) + bv_ref[...]
        k_scratch[...] = k.reshape(bblk, s2, d_out).astype(cdt)
        v_scratch[...] = v.reshape(bblk, s2, d_out).astype(cdt)

    # ---- Q projection (softmax scale already folded into wq/bq on host) ----
    q_in = q_ref[...].reshape(bblk * tq, dq).astype(cdt)
    q = jnp.dot(q_in, wq_ref[...],
                preferred_element_type=jnp.float32) + bq_ref[...]
    q3 = q.reshape(bblk, tq, d_out).astype(cdt)

    k3 = k_scratch[...]
    v3 = v_scratch[...]

    # ---- Per-head attention; lane-dense (…, S2) scores, f32 softmax math.
    #      Each head's context lands in ctx_scratch at its static lane offset
    #      so the output projection is a single K=D_out matmul. ----
    for h in range(num_heads):                  # static unroll over heads
        lo = h * dh
        qh = q3[:, :, lo:lo + dh]               # (Bblk, TQ, dh)
        kh = k3[:, :, lo:lo + dh]               # (Bblk, S2, dh)
        vh = v3[:, :, lo:lo + dh]               # (Bblk, S2, dh)

        s = jnp.einsum('bqd,bkd->bqk', qh, kh,
                       preferred_element_type=jnp.float32)

        # numerically stable softmax over S2 (f32 elementwise; exp on EUP)
        m = jnp.max(s, axis=-1, keepdims=True)
        p = jnp.exp(s - m)
        inv = pl.reciprocal(jnp.sum(p, axis=-1, keepdims=True), approx=True)

        # normalization folded into the small (TQ, dh) context, not the
        # (TQ, S2) probabilities
        ctx_h = jnp.einsum('bqk,bkd->bqd', p.astype(cdt), vh,
                           preferred_element_type=jnp.float32) * inv
        ctx_scratch[:, :, lo:lo + dh] = ctx_h
        # TODO(synk): training-mode dropout on attn not implemented (identity).

    # ---- Fused output projection: one matmul with K = D_out ----
    ctx = ctx_scratch[...].reshape(bblk * tq, d_out).astype(cdt)
    out = jnp.dot(ctx, wo_ref[...],
                  preferred_element_type=jnp.float32) + bo_ref[...]
    o_ref[...] = out.reshape(bblk, tq, d_out).astype(o_ref.dtype)


def _largest_divisor_leq(n, cap):
    cap = max(1, min(n, cap))
    for d in range(cap, 0, -1):
        if n % d == 0:
            return d
    return 1


def _vmem_limit_bytes():
    """Per-generation VMEM budget: ~3/4 of physical per-core VMEM
    (~48 MiB on v7x, ~96 MiB on v5e/v6e); falls back to the most
    restrictive generation if the query is unavailable."""
    try:
        cap = int(pltpu.get_tpu_info().vmem_capacity_bytes)
    except Exception:
        cap = 64 * 1024 * 1024
    return (cap * 3) // 4


def cross_attention(query, key_value, params, *, num_heads):
    """query: (B, S1, Dq), key_value: (B, S2, Dkv) -> (B, S1, D_out)."""
    B, S1, Dq = query.shape
    Bk, S2, Dkv = key_value.shape
    assert B == Bk
    D_out = params['wq'].shape[1]
    assert D_out % num_heads == 0
    dh = D_out // num_heads
    scale = float(dh ** (-0.5))

    # Fold the softmax scale into the query projection (linear => exact) and
    # pre-cast weights to bf16 (MXU operands are bf16 anyway; halves weight
    # DMA + VMEM).  Biases stay f32: tiny, and added to the f32 accumulator.
    wq = (params['wq'] * scale).astype(jnp.bfloat16)
    bq = params['bq'] * scale
    wk = params['wk'].astype(jnp.bfloat16)
    wv = params['wv'].astype(jnp.bfloat16)
    wo = params['wo'].astype(jnp.bfloat16)
    bk, bv, bo = params['bk'], params['bv'], params['bo']

    # Batch-blocking: aim for ~512 projection rows per grid step (amortizes
    # the 256-deep MXU fill/drain on v6e/v7x) while bounding the activation
    # block for VMEM.
    row_target = 512
    cap = max(1, pl.cdiv(row_target, S1))
    cap = min(cap, max(1, 8192 // max(S1, S2, 1)))
    Bblk = _largest_divisor_leq(B, cap)

    # Query-sequence tiling bounds the (Bblk, TQ, S2) scores intermediate.
    if S1 > 512 and S1 % 512 == 0:
        TQ = 512
    elif S1 > 256 and S1 % 256 == 0:
        TQ = 256
    else:
        TQ = S1
    grid = (B // Bblk, S1 // TQ)

    kernel = functools.partial(_cross_attention_kernel, num_heads=num_heads)

    # Weight/bias blocks: constant index maps => fetched once, never re-DMA'd.
    def wspec(shape):
        return pl.BlockSpec(shape, lambda b, qb: (0,) * len(shape))

    # Advisory cost estimate so XLA schedules around a correctly-sized call.
    flops = int(2 * B * S1 * Dq * D_out            # Q projection
                + 4 * B * S2 * Dkv * D_out         # K and V projections
                + 4 * B * S1 * S2 * D_out          # scores + attn@V (all heads)
                + 2 * B * S1 * D_out * D_out)      # output projection
    transcendentals = int(B * num_heads * S1 * S2)
    bytes_accessed = int(4 * (B * S1 * Dq + B * S2 * Dkv + B * S1 * D_out)
                         + 2 * (Dq * D_out + 2 * Dkv * D_out + D_out * D_out)
                         + 4 * 4 * D_out)

    return pl.pallas_call(
        kernel,
        out_shape=jax.ShapeDtypeStruct((B, S1, D_out), query.dtype),
        grid_spec=pltpu.PrefetchScalarGridSpec(
            num_scalar_prefetch=0,
            grid=grid,
            in_specs=[
                pl.BlockSpec((Bblk, TQ, Dq), lambda b, qb: (b, qb, 0)),
                pl.BlockSpec((Bblk, S2, Dkv), lambda b, qb: (b, 0, 0)),
                wspec((Dq, D_out)),    wspec((1, D_out)),   # wq, bq
                wspec((Dkv, D_out)),   wspec((1, D_out)),   # wk, bk
                wspec((Dkv, D_out)),   wspec((1, D_out)),   # wv, bv
                wspec((D_out, D_out)), wspec((1, D_out)),   # wo, bo
            ],
            out_specs=pl.BlockSpec((Bblk, TQ, D_out), lambda b, qb: (b, qb, 0)),
            scratch_shapes=[
                pltpu.VMEM((Bblk, S2, D_out), jnp.bfloat16),   # cached K proj
                pltpu.VMEM((Bblk, S2, D_out), jnp.bfloat16),   # cached V proj
                pltpu.VMEM((Bblk, TQ, D_out), jnp.float32),    # per-head ctx slab
            ]),
        compiler_params=pltpu.CompilerParams(
            # qb must be "arbitrary": the cached K/V scratch is written at
            # qb == 0 and consumed by all later q-tiles of the same b-block.
            dimension_semantics=("parallel", "arbitrary"),
            vmem_limit_bytes=_vmem_limit_bytes()),
        cost_estimate=pl.CostEstimate(flops=flops,
                                      transcendentals=transcendentals,
                                      bytes_accessed=bytes_accessed),
    )(query, key_value, wq, bq, wk, bk, wv, bv, wo, bo)


def init_params(key, dim_query, dim_kv, dim_out):
    """Deterministic parameter init. Weights stored pre-transposed: (D_in, D_out)."""
    ks = jax.random.split(key, 8)

    def linear(kw, kb, d_in, d_out):
        bound = 1.0 / (d_in ** 0.5)
        w = jax.random.uniform(kw, (d_in, d_out), jnp.float32, -bound, bound)
        b = jax.random.uniform(kb, (1, d_out), jnp.float32, -bound, bound)
        return w, b

    wq, bq = linear(ks[0], ks[1], dim_query, dim_out)
    wk, bk = linear(ks[2], ks[3], dim_kv, dim_out)
    wv, bv = linear(ks[4], ks[5], dim_kv, dim_out)
    wo, bo = linear(ks[6], ks[7], dim_out, dim_out)
    return dict(wq=wq, bq=bq, wk=wk, bk=bk, wv=wv, bv=bv, wo=wo, bo=bo)


def cross_attention_ref(query, key_value, params, *, num_heads):
    """Pure-JAX f32 reference matching the PyTorch module (dropout = identity)."""
    D_out = params['wq'].shape[1]
    dh = D_out // num_heads
    scale = (D_out // num_heads) ** (-0.5)
    q = query @ params['wq'] + params['bq'][0]
    k = key_value @ params['wk'] + params['bk'][0]
    v = key_value @ params['wv'] + params['bv'][0]
    B, S1, _ = q.shape
    S2 = k.shape[1]
    q = q.reshape(B, S1, num_heads, dh).transpose(0, 2, 1, 3)
    k = k.reshape(B, S2, num_heads, dh).transpose(0, 2, 1, 3)
    v = v.reshape(B, S2, num_heads, dh).transpose(0, 2, 1, 3)
    scores = jnp.einsum('bhqd,bhkd->bhqk', q, k) * scale
    attn = jax.nn.softmax(scores, axis=-1)
    out = jnp.einsum('bhqk,bhkd->bhqd', attn, v)
    out = out.transpose(0, 2, 1, 3).reshape(B, S1, D_out)
    return out @ params['wo'] + params['bo'][0]


if __name__ == "__main__":
    # Small shapes consistent with the module's forward.
    B, S1, S2 = 2, 8, 8
    dim_query, dim_kv, dim_out, num_heads = 32, 32, 32, 4

    key = jax.random.PRNGKey(0)
    kq, kkv, kp = jax.random.split(key, 3)
    query = jax.random.normal(kq, (B, S1, dim_query), jnp.float32)
    key_value = jax.random.normal(kkv, (B, S2, dim_kv), jnp.float32)
    params = init_params(kp, dim_query, dim_kv, dim_out)

    out = cross_attention(query, key_value, params, num_heads=num_heads)
    out = jax.block_until_ready(out)

    ref = cross_attention_ref(query, key_value, params, num_heads=num_heads)
    assert out.shape == (B, S1, dim_out)
    # bf16 MXU operands (f32 accumulation) + approx reciprocal => relaxed tol.
    max_err = float(jnp.max(jnp.abs(out - ref)))
    assert jnp.allclose(out, ref, atol=2e-2, rtol=2e-2), max_err

    print("KERNEL_OK")
</pallas_src>

<mosaic_0001>
module attributes {stable_mosaic.version = 11 : i64} {
  func.func @_cross_attention_kernel(%arg0: i32, %arg1: i32, %arg2: memref<2x8x32xf32, #tpu.memory_space<vmem>>, %arg3: memref<2x8x32xf32, #tpu.memory_space<vmem>>, %arg4: memref<32x32xbf16, #tpu.memory_space<vmem>>, %arg5: memref<1x32xf32, #tpu.memory_space<vmem>>, %arg6: memref<32x32xbf16, #tpu.memory_space<vmem>>, %arg7: memref<1x32xf32, #tpu.memory_space<vmem>>, %arg8: memref<32x32xbf16, #tpu.memory_space<vmem>>, %arg9: memref<1x32xf32, #tpu.memory_space<vmem>>, %arg10: memref<32x32xbf16, #tpu.memory_space<vmem>>, %arg11: memref<1x32xf32, #tpu.memory_space<vmem>>, %arg12: memref<2x8x32xf32, #tpu.memory_space<vmem>>, %arg13: memref<2x8x32xbf16, #tpu.memory_space<vmem>>, %arg14: memref<2x8x32xbf16, #tpu.memory_space<vmem>>, %arg15: memref<2x8x32xf32, #tpu.memory_space<vmem>>) attributes {dimension_semantics = [#tpu.dimension_semantics<parallel>, #tpu.dimension_semantics<arbitrary>], iteration_bounds = array<i64: 1, 1>, scalar_prefetch = 0 : i64, scratch_operands = 3 : i64, tpu.core_type = #tpu.core_type<tc>, window_params = [{transform_indices = @transform_0, window_bounds = array<i64: 2, 8, 32>}, {transform_indices = @transform_1, window_bounds = array<i64: 2, 8, 32>}, {pipeline_mode = #tpu.pipeline_mode<synchronous>, transform_indices = @transform_2, window_bounds = array<i64: 32, 32>}, {pipeline_mode = #tpu.pipeline_mode<synchronous>, transform_indices = @transform_3, window_bounds = array<i64: 1, 32>}, {pipeline_mode = #tpu.pipeline_mode<synchronous>, transform_indices = @transform_4, window_bounds = array<i64: 32, 32>}, {pipeline_mode = #tpu.pipeline_mode<synchronous>, transform_indices = @transform_5, window_bounds = array<i64: 1, 32>}, {pipeline_mode = #tpu.pipeline_mode<synchronous>, transform_indices = @transform_6, window_bounds = array<i64: 32, 32>}, {pipeline_mode = #tpu.pipeline_mode<synchronous>, transform_indices = @transform_7, window_bounds = array<i64: 1, 32>}, {pipeline_mode = #tpu.pipeline_mode<synchronous>, transform_indices = @transform_8, window_bounds = array<i64: 32, 32>}, {pipeline_mode = #tpu.pipeline_mode<synchronous>, transform_indices = @transform_9, window_bounds = array<i64: 1, 32>}, {transform_indices = @transform_10, window_bounds = array<i64: 2, 8, 32>}]} {
    %c0_i32 = arith.constant 0 : i32
    %0 = arith.cmpi eq, %arg1, %c0_i32 : i32
    %1 = arith.extui %0 : i1 to i32
    %c0_i32_0 = arith.constant 0 : i32
    %2 = arith.cmpi ne, %1, %c0_i32_0 : i32
    scf.if %2 {
      %c0_49 = arith.constant 0 : index
      %c0_50 = arith.constant 0 : index
      %c0_51 = arith.constant 0 : index
      %93 = vector.load %arg3[%c0_49, %c0_50, %c0_51] : memref<2x8x32xf32, #tpu.memory_space<vmem>>, vector<2x8x32xf32>
      %94 = vector.shape_cast %93 : vector<2x8x32xf32> to vector<16x32xf32>
      %95 = arith.truncf %94 : vector<16x32xf32> to vector<16x32xbf16>
      %c0_52 = arith.constant 0 : index
      %c0_53 = arith.constant 0 : index
      %96 = vector.load %arg6[%c0_52, %c0_53] : memref<32x32xbf16, #tpu.memory_space<vmem>>, vector<32x32xbf16>
      %cst_54 = arith.constant dense<0.000000e+00> : vector<16x32xf32>
      %97 = tpu.matmul %95, %96, %cst_54 {dimension_numbers = #tpu.dot_dimension_numbers<[1], [0], [0], [1], [0, 0, 1, 1], [], []>} : vector<16x32xbf16>, vector<32x32xbf16>, vector<16x32xf32> -> vector<16x32xf32>
      %c0_55 = arith.constant 0 : index
      %c0_56 = arith.constant 0 : index
      %98 = vector.load %arg7[%c0_55, %c0_56] : memref<1x32xf32, #tpu.memory_space<vmem>>, vector<1x32xf32>
      %99 = vector.broadcast %98 : vector<1x32xf32> to vector<16x32xf32>
      %100 = arith.addf %97, %99 : vector<16x32xf32>
      %c0_57 = arith.constant 0 : index
      %c0_58 = arith.constant 0 : index
      %101 = vector.load %arg8[%c0_57, %c0_58] : memref<32x32xbf16, #tpu.memory_space<vmem>>, vector<32x32xbf16>
      %cst_59 = arith.constant dense<0.000000e+00> : vector<16x32xf32>
      %102 = tpu.matmul %95, %101, %cst_59 {dimension_numbers = #tpu.dot_dimension_numbers<[1], [0], [0], [1], [0, 0, 1, 1], [], []>} : vector<16x32xbf16>, vector<32x32xbf16>, vector<16x32xf32> -> vector<16x32xf32>
      %c0_60 = arith.constant 0 : index
      %c0_61 = arith.constant 0 : index
      %103 = vector.load %arg9[%c0_60, %c0_61] : memref<1x32xf32, #tpu.memory_space<vmem>>, vector<1x32xf32>
      %104 = vector.broadcast %103 : vector<1x32xf32> to vector<16x32xf32>
      %105 = arith.addf %102, %104 : vector<16x32xf32>
      %106 = vector.shape_cast %100 : vector<16x32xf32> to vector<2x8x32xf32>
      %107 = arith.truncf %106 : vector<2x8x32xf32> to vector<2x8x32xbf16>
      %c0_62 = arith.constant 0 : index
      %c0_63 = arith.constant 0 : index
      %c0_64 = arith.constant 0 : index
      %108 = vector.load %arg13[%c0_62, %c0_63, %c0_64] : memref<2x8x32xbf16, #tpu.memory_space<vmem>>, vector<2x8x32xbf16>
      tpu.vector_store %arg13[%c0_62, %c0_63, %c0_64], %107 {strides = array<i32>} : memref<2x8x32xbf16, #tpu.memory_space<vmem>>, vector<2x8x32xbf16>,
      %109 = vector.shape_cast %105 : vector<16x32xf32> to vector<2x8x32xf32>
      %110 = arith.truncf %109 : vector<2x8x32xf32> to vector<2x8x32xbf16>
      %c0_65 = arith.constant 0 : index
      %c0_66 = arith.constant 0 : index
      %c0_67 = arith.constant 0 : index
      %111 = vector.load %arg14[%c0_65, %c0_66, %c0_67] : memref<2x8x32xbf16, #tpu.memory_space<vmem>>, vector<2x8x32xbf16>
      tpu.vector_store %arg14[%c0_65, %c0_66, %c0_67], %110 {strides = array<i32>} : memref<2x8x32xbf16, #tpu.memory_space<vmem>>, vector<2x8x32xbf16>,
    } else {
    }
    %c0 = arith.constant 0 : index
    %c0_1 = arith.constant 0 : index
    %c0_2 = arith.constant 0 : index
    %3 = vector.load %arg2[%c0, %c0_1, %c0_2] : memref<2x8x32xf32, #tpu.memory_space<vmem>>, vector<2x8x32xf32>
    %4 = vector.shape_cast %3 : vector<2x8x32xf32> to vector<16x32xf32>
    %5 = arith.truncf %4 : vector<16x32xf32> to vector<16x32xbf16>
    %c0_3 = arith.constant 0 : index
    %c0_4 = arith.constant 0 : index
    %6 = vector.load %arg4[%c0_3, %c0_4] : memref<32x32xbf16, #tpu.memory_space<vmem>>, vector<32x32xbf16>
    %cst = arith.constant dense<0.000000e+00> : vector<16x32xf32>
    %7 = tpu.matmul %5, %6, %cst {dimension_numbers = #tpu.dot_dimension_numbers<[1], [0], [0], [1], [0, 0, 1, 1], [], []>} : vector<16x32xbf16>, vector<32x32xbf16>, vector<16x32xf32> -> vector<16x32xf32>
    %c0_5 = arith.constant 0 : index
    %c0_6 = arith.constant 0 : index
    %8 = vector.load %arg5[%c0_5, %c0_6] : memref<1x32xf32, #tpu.memory_space<vmem>>, vector<1x32xf32>
    %9 = vector.broadcast %8 : vector<1x32xf32> to vector<16x32xf32>
    %10 = arith.addf %7, %9 : vector<16x32xf32>
    %11 = vector.shape_cast %10 : vector<16x32xf32> to vector<2x8x32xf32>
    %12 = arith.truncf %11 : vector<2x8x32xf32> to vector<2x8x32xbf16>
    %c0_7 = arith.constant 0 : index
    %c0_8 = arith.constant 0 : index
    %c0_9 = arith.constant 0 : index
    %13 = vector.load %arg13[%c0_7, %c0_8, %c0_9] : memref<2x8x32xbf16, #tpu.memory_space<vmem>>, vector<2x8x32xbf16>
    %c0_10 = arith.constant 0 : index
    %c0_11 = arith.constant 0 : index
    %c0_12 = arith.constant 0 : index
    %14 = vector.load %arg14[%c0_10, %c0_11, %c0_12] : memref<2x8x32xbf16, #tpu.memory_space<vmem>>, vector<2x8x32xbf16>
    %15 = vector.extract_strided_slice %12 {offsets = [0, 0, 0], sizes = [2, 8, 8], strides = [1, 1, 1]} : vector<2x8x32xbf16> to vector<2x8x8xbf16>
    %16 = vector.extract_strided_slice %13 {offsets = [0, 0, 0], sizes = [2, 8, 8], strides = [1, 1, 1]} : vector<2x8x32xbf16> to vector<2x8x8xbf16>
    %17 = vector.extract_strided_slice %14 {offsets = [0, 0, 0], sizes = [2, 8, 8], strides = [1, 1, 1]} : vector<2x8x32xbf16> to vector<2x8x8xbf16>
    "tpu.trace_start"() <{level = 10 : i32, message = "bqd,bkd->bqk"}> : () -> ()
    %cst_13 = arith.constant dense<0.000000e+00> : vector<2x8x8xf32>
    %18 = tpu.matmul %15, %16, %cst_13 {dimension_numbers = #tpu.dot_dimension_numbers<[2], [2], [1], [1], [0, 0, 0, 1, 1, 1], [0], [0]>} : vector<2x8x8xbf16>, vector<2x8x8xbf16>, vector<2x8x8xf32> -> vector<2x8x8xf32>
    "tpu.trace_stop"() : () -> ()
    %cst_14 = arith.constant dense<0xFF800000> : vector<2x8xf32>
    %19 = vector.multi_reduction <maximumf>, %18, %cst_14 [2] : vector<2x8x8xf32> to vector<2x8xf32>
    %20 = vector.shape_cast %19 : vector<2x8xf32> to vector<2x8x1xf32>
    %21 = vector.broadcast %20 : vector<2x8x1xf32> to vector<2x8x8xf32>
    %22 = arith.subf %18, %21 : vector<2x8x8xf32>
    %23 = math.exp %22 : vector<2x8x8xf32>
    %cst_15 = arith.constant dense<0.000000e+00> : vector<2x8xf32>
    %24 = vector.multi_reduction <add>, %23, %cst_15 [2] : vector<2x8x8xf32> to vector<2x8xf32>
    %25 = vector.shape_cast %24 : vector<2x8xf32> to vector<2x8x1xf32>
    %26 = tpu.reciprocal %25 {approx = true} : vector<2x8x1xf32> -> vector<2x8x1xf32>
    %27 = arith.truncf %23 : vector<2x8x8xf32> to vector<2x8x8xbf16>
    "tpu.trace_start"() <{level = 10 : i32, message = "bqk,bkd->bqd"}> : () -> ()
    %cst_16 = arith.constant dense<0.000000e+00> : vector<2x8x8xf32>
    %28 = tpu.matmul %27, %17, %cst_16 {dimension_numbers = #tpu.dot_dimension_numbers<[2], [1], [1], [2], [0, 0, 0, 1, 1, 2], [0], [0]>} : vector<2x8x8xbf16>, vector<2x8x8xbf16>, vector<2x8x8xf32> -> vector<2x8x8xf32>
    "tpu.trace_stop"() : () -> ()
    %29 = vector.broadcast %26 : vector<2x8x1xf32> to vector<2x8x8xf32>
    %30 = arith.mulf %28, %29 : vector<2x8x8xf32>
    %c0_17 = arith.constant 0 : index
    %c0_18 = arith.constant 0 : index
    %c0_19 = arith.constant 0 : index
    %31 = vector.load %arg15[%c0_17, %c0_18, %c0_19] : memref<2x8x32xf32, #tpu.memory_space<vmem>>, vector<2x8x8xf32>
    tpu.vector_store %arg15[%c0_17, %c0_18, %c0_19], %30 {strides = array<i32>} : memref<2x8x32xf32, #tpu.memory_space<vmem>>, vector<2x8x8xf32>,
    %32 = vector.extract_strided_slice %12 {offsets = [0, 0, 8], sizes = [2, 8, 8], strides = [1, 1, 1]} : vector<2x8x32xbf16> to vector<2x8x8xbf16>
    %33 = vector.extract_strided_slice %13 {offsets = [0, 0, 8], sizes = [2, 8, 8], strides = [1, 1, 1]} : vector<2x8x32xbf16> to vector<2x8x8xbf16>
    %34 = vector.extract_strided_slice %14 {offsets = [0, 0, 8], sizes = [2, 8, 8], strides = [1, 1, 1]} : vector<2x8x32xbf16> to vector<2x8x8xbf16>
    "tpu.trace_start"() <{level = 10 : i32, message = "bqd,bkd->bqk"}> : () -> ()
    %cst_20 = arith.constant dense<0.000000e+00> : vector<2x8x8xf32>
    %35 = tpu.matmul %32, %33, %cst_20 {dimension_numbers = #tpu.dot_dimension_numbers<[2], [2], [1], [1], [0, 0, 0, 1, 1, 1], [0], [0]>} : vector<2x8x8xbf16>, vector<2x8x8xbf16>, vector<2x8x8xf32> -> vector<2x8x8xf32>
    "tpu.trace_stop"() : () -> ()
    %cst_21 = arith.constant dense<0xFF800000> : vector<2x8xf32>
    %36 = vector.multi_reduction <maximumf>, %35, %cst_21 [2] : vector<2x8x8xf32> to vector<2x8xf32>
    %37 = vector.shape_cast %36 : vector<2x8xf32> to vector<2x8x1xf32>
    %38 = vector.broadcast %37 : vector<2x8x1xf32> to vector<2x8x8xf32>
    %39 = arith.subf %35, %38 : vector<2x8x8xf32>
    %40 = math.exp %39 : vector<2x8x8xf32>
    %cst_22 = arith.constant dense<0.000000e+00> : vector<2x8xf32>
    %41 = vector.multi_reduction <add>, %40, %cst_22 [2] : vector<2x8x8xf32> to vector<2x8xf32>
    %42 = vector.shape_cast %41 : vector<2x8xf32> to vector<2x8x1xf32>
    %43 = tpu.reciprocal %42 {approx = true} : vector<2x8x1xf32> -> vector<2x8x1xf32>
    %44 = arith.truncf %40 : vector<2x8x8xf32> to vector<2x8x8xbf16>
    "tpu.trace_start"() <{level = 10 : i32, message = "bqk,bkd->bqd"}> : () -> ()
    %cst_23 = arith.constant dense<0.000000e+00> : vector<2x8x8xf32>
    %45 = tpu.matmul %44, %34, %cst_23 {dimension_numbers = #tpu.dot_dimension_numbers<[2], [1], [1], [2], [0, 0, 0, 1, 1, 2], [0], [0]>} : vector<2x8x8xbf16>, vector<2x8x8xbf16>, vector<2x8x8xf32> -> vector<2x8x8xf32>
    "tpu.trace_stop"() : () -> ()
    %46 = vector.broadcast %43 : vector<2x8x1xf32> to vector<2x8x8xf32>
    %47 = arith.mulf %45, %46 : vector<2x8x8xf32>
    %c0_24 = arith.constant 0 : index
    %c0_25 = arith.constant 0 : index
    %c8 = arith.constant 8 : index
    %48 = vector.load %arg15[%c0_24, %c0_25, %c8] : memref<2x8x32xf32, #tpu.memory_space<vmem>>, vector<2x8x8xf32>
    tpu.vector_store %arg15[%c0_24, %c0_25, %c8], %47 {strides = array<i32>} : memref<2x8x32xf32, #tpu.memory_space<vmem>>, vector<2x8x8xf32>,
    %49 = vector.extract_strided_slice %12 {offsets = [0, 0, 16], sizes = [2, 8, 8], strides = [1, 1, 1]} : vector<2x8x32xbf16> to vector<2x8x8xbf16>
    %50 = vector.extract_strided_slice %13 {offsets = [0, 0, 16], sizes = [2, 8, 8], strides = [1, 1, 1]} : vector<2x8x32xbf16> to vector<2x8x8xbf16>
    %51 = vector.extract_strided_slice %14 {offsets = [0, 0, 16], sizes = [2, 8, 8], strides = [1, 1, 1]} : vector<2x8x32xbf16> to vector<2x8x8xbf16>
    "tpu.trace_start"() <{level = 10 : i32, message = "bqd,bkd->bqk"}> : () -> ()
    %cst_26 = arith.constant dense<0.000000e+00> : vector<2x8x8xf32>
    %52 = tpu.matmul %49, %50, %cst_26 {dimension_numbers = #tpu.dot_dimension_numbers<[2], [2], [1], [1], [0, 0, 0, 1, 1, 1], [0], [0]>} : vector<2x8x8xbf16>, vector<2x8x8xbf16>, vector<2x8x8xf32> -> vector<2x8x8xf32>
    "tpu.trace_stop"() : () -> ()
    %cst_27 = arith.constant dense<0xFF800000> : vector<2x8xf32>
    %53 = vector.multi_reduction <maximumf>, %52, %cst_27 [2] : vector<2x8x8xf32> to vector<2x8xf32>
    %54 = vector.shape_cast %53 : vector<2x8xf32> to vector<2x8x1xf32>
    %55 = vector.broadcast %54 : vector<2x8x1xf32> to vector<2x8x8xf32>
    %56 = arith.subf %52, %55 : vector<2x8x8xf32>
    %57 = math.exp %56 : vector<2x8x8xf32>
    %cst_28 = arith.constant dense<0.000000e+00> : vector<2x8xf32>
    %58 = vector.multi_reduction <add>, %57, %cst_28 [2] : vector<2x8x8xf32> to vector<2x8xf32>
    %59 = vector.shape_cast %58 : vector<2x8xf32> to vector<2x8x1xf32>
    %60 = tpu.reciprocal %59 {approx = true} : vector<2x8x1xf32> -> vector<2x8x1xf32>
    %61 = arith.truncf %57 : vector<2x8x8xf32> to vector<2x8x8xbf16>
    "tpu.trace_start"() <{level = 10 : i32, message = "bqk,bkd->bqd"}> : () -> ()
    %cst_29 = arith.constant dense<0.000000e+00> : vector<2x8x8xf32>
    %62 = tpu.matmul %61, %51, %cst_29 {dimension_numbers = #tpu.dot_dimension_numbers<[2], [1], [1], [2], [0, 0, 0, 1, 1, 2], [0], [0]>} : vector<2x8x8xbf16>, vector<2x8x8xbf16>, vector<2x8x8xf32> -> vector<2x8x8xf32>
    "tpu.trace_stop"() : () -> ()
    %63 = vector.broadcast %60 : vector<2x8x1xf32> to vector<2x8x8xf32>
    %64 = arith.mulf %62, %63 : vector<2x8x8xf32>
    %c0_30 = arith.constant 0 : index
    %c0_31 = arith.constant 0 : index
    %c16 = arith.constant 16 : index
    %65 = vector.load %arg15[%c0_30, %c0_31, %c16] : memref<2x8x32xf32, #tpu.memory_space<vmem>>, vector<2x8x8xf32>
    tpu.vector_store %arg15[%c0_30, %c0_31, %c16], %64 {strides = array<i32>} : memref<2x8x32xf32, #tpu.memory_space<vmem>>, vector<2x8x8xf32>,
    %66 = vector.extract_strided_slice %12 {offsets = [0, 0, 24], sizes = [2, 8, 8], strides = [1, 1, 1]} : vector<2x8x32xbf16> to vector<2x8x8xbf16>
    %67 = vector.extract_strided_slice %13 {offsets = [0, 0, 24], sizes = [2, 8, 8], strides = [1, 1, 1]} : vector<2x8x32xbf16> to vector<2x8x8xbf16>
    %68 = vector.extract_strided_slice %14 {offsets = [0, 0, 24], sizes = [2, 8, 8], strides = [1, 1, 1]} : vector<2x8x32xbf16> to vector<2x8x8xbf16>
    "tpu.trace_start"() <{level = 10 : i32, message = "bqd,bkd->bqk"}> : () -> ()
    %cst_32 = arith.constant dense<0.000000e+00> : vector<2x8x8xf32>
    %69 = tpu.matmul %66, %67, %cst_32 {dimension_numbers = #tpu.dot_dimension_numbers<[2], [2], [1], [1], [0, 0, 0, 1, 1, 1], [0], [0]>} : vector<2x8x8xbf16>, vector<2x8x8xbf16>, vector<2x8x8xf32> -> vector<2x8x8xf32>
    "tpu.trace_stop"() : () -> ()
    %cst_33 = arith.constant dense<0xFF800000> : vector<2x8xf32>
    %70 = vector.multi_reduction <maximumf>, %69, %cst_33 [2] : vector<2x8x8xf32> to vector<2x8xf32>
    %71 = vector.shape_cast %70 : vector<2x8xf32> to vector<2x8x1xf32>
    %72 = vector.broadcast %71 : vector<2x8x1xf32> to vector<2x8x8xf32>
    %73 = arith.subf %69, %72 : vector<2x8x8xf32>
    %74 = math.exp %73 : vector<2x8x8xf32>
    %cst_34 = arith.constant dense<0.000000e+00> : vector<2x8xf32>
    %75 = vector.multi_reduction <add>, %74, %cst_34 [2] : vector<2x8x8xf32> to vector<2x8xf32>
    %76 = vector.shape_cast %75 : vector<2x8xf32> to vector<2x8x1xf32>
    %77 = tpu.reciprocal %76 {approx = true} : vector<2x8x1xf32> -> vector<2x8x1xf32>
    %78 = arith.truncf %74 : vector<2x8x8xf32> to vector<2x8x8xbf16>
    "tpu.trace_start"() <{level = 10 : i32, message = "bqk,bkd->bqd"}> : () -> ()
    %cst_35 = arith.constant dense<0.000000e+00> : vector<2x8x8xf32>
    %79 = tpu.matmul %78, %68, %cst_35 {dimension_numbers = #tpu.dot_dimension_numbers<[2], [1], [1], [2], [0, 0, 0, 1, 1, 2], [0], [0]>} : vector<2x8x8xbf16>, vector<2x8x8xbf16>, vector<2x8x8xf32> -> vector<2x8x8xf32>
    "tpu.trace_stop"() : () -> ()
    %80 = vector.broadcast %77 : vector<2x8x1xf32> to vector<2x8x8xf32>
    %81 = arith.mulf %79, %80 : vector<2x8x8xf32>
    %c0_36 = arith.constant 0 : index
    %c0_37 = arith.constant 0 : index
    %c24 = arith.constant 24 : index
    %82 = vector.load %arg15[%c0_36, %c0_37, %c24] : memref<2x8x32xf32, #tpu.memory_space<vmem>>, vector<2x8x8xf32>
    tpu.vector_store %arg15[%c0_36, %c0_37, %c24], %81 {strides = array<i32>} : memref<2x8x32xf32, #tpu.memory_space<vmem>>, vector<2x8x8xf32>,
    %c0_38 = arith.constant 0 : index
    %c0_39 = arith.constant 0 : index
    %c0_40 = arith.constant 0 : index
    %83 = vector.load %arg15[%c0_38, %c0_39, %c0_40] : memref<2x8x32xf32, #tpu.memory_space<vmem>>, vector<2x8x32xf32>
    %84 = vector.shape_cast %83 : vector<2x8x32xf32> to vector<16x32xf32>
    %85 = arith.truncf %84 : vector<16x32xf32> to vector<16x32xbf16>
    %c0_41 = arith.constant 0 : index
    %c0_42 = arith.constant 0 : index
    %86 = vector.load %arg10[%c0_41, %c0_42] : memref<32x32xbf16, #tpu.memory_space<vmem>>, vector<32x32xbf16>
    %cst_43 = arith.constant dense<0.000000e+00> : vector<16x32xf32>
    %87 = tpu.matmul %85, %86, %cst_43 {dimension_numbers = #tpu.dot_dimension_numbers<[1], [0], [0], [1], [0, 0, 1, 1], [], []>} : vector<16x32xbf16>, vector<32x32xbf16>, vector<16x32xf32> -> vector<16x32xf32>
    %c0_44 = arith.constant 0 : index
    %c0_45 = arith.constant 0 : index
    %88 = vector.load %arg11[%c0_44, %c0_45] : memref<1x32xf32, #tpu.memory_space<vmem>>, vector<1x32xf32>
    %89 = vector.broadcast %88 : vector<1x32xf32> to vector<16x32xf32>
    %90 = arith.addf %87, %89 : vector<16x32xf32>
    %91 = vector.shape_cast %90 : vector<16x32xf32> to vector<2x8x32xf32>
    %c0_46 = arith.constant 0 : index
    %c0_47 = arith.constant 0 : index
    %c0_48 = arith.constant 0 : index
    %92 = vector.load %arg12[%c0_46, %c0_47, %c0_48] : memref<2x8x32xf32, #tpu.memory_space<vmem>>, vector<2x8x32xf32>
    tpu.vector_store %arg12[%c0_46, %c0_47, %c0_48], %91 {strides = array<i32>} : memref<2x8x32xf32, #tpu.memory_space<vmem>>, vector<2x8x32xf32>,
    return
  }
  func.func @transform_0(%arg0: i32, %arg1: i32) -> (i32, i32, i32) {
    %c0_i32 = arith.constant 0 : i32
    %c0_i32_0 = arith.constant 0 : i32
    return %arg0, %arg1, %c0_i32 : i32, i32, i32
  }
  func.func @transform_1(%arg0: i32, %arg1: i32) -> (i32, i32, i32) {
    %c0_i32 = arith.constant 0 : i32
    %c0_i32_0 = arith.constant 0 : i32
    %c0_i32_1 = arith.constant 0 : i32
    return %arg0, %c0_i32, %c0_i32_0 : i32, i32, i32
  }
  func.func @transform_2(%arg0: i32, %arg1: i32) -> (i32, i32) {
    %c0_i32 = arith.constant 0 : i32
    %c0_i32_0 = arith.constant 0 : i32
    %c0_i32_1 = arith.constant 0 : i32
    return %c0_i32, %c0_i32_0 : i32, i32
  }
  func.func @transform_3(%arg0: i32, %arg1: i32) -> (i32, i32) {
    %c0_i32 = arith.constant 0 : i32
    %c0_i32_0 = arith.constant 0 : i32
    %c0_i32_1 = arith.constant 0 : i32
    return %c0_i32, %c0_i32_0 : i32, i32
  }
  func.func @transform_4(%arg0: i32, %arg1: i32) -> (i32, i32) {
    %c0_i32 = arith.constant 0 : i32
    %c0_i32_0 = arith.constant 0 : i32
    %c0_i32_1 = arith.constant 0 : i32
    return %c0_i32, %c0_i32_0 : i32, i32
  }
  func.func @transform_5(%arg0: i32, %arg1: i32) -> (i32, i32) {
    %c0_i32 = arith.constant 0 : i32
    %c0_i32_0 = arith.constant 0 : i32
    %c0_i32_1 = arith.constant 0 : i32
    return %c0_i32, %c0_i32_0 : i32, i32
  }
  func.func @transform_6(%arg0: i32, %arg1: i32) -> (i32, i32) {
    %c0_i32 = arith.constant 0 : i32
    %c0_i32_0 = arith.constant 0 : i32
    %c0_i32_1 = arith.constant 0 : i32
    return %c0_i32, %c0_i32_0 : i32, i32
  }
  func.func @transform_7(%arg0: i32, %arg1: i32) -> (i32, i32) {
    %c0_i32 = arith.constant 0 : i32
    %c0_i32_0 = arith.constant 0 : i32
    %c0_i32_1 = arith.constant 0 : i32
    return %c0_i32, %c0_i32_0 : i32, i32
  }
  func.func @transform_8(%arg0: i32, %arg1: i32) -> (i32, i32) {
    %c0_i32 = arith.constant 0 : i32
    %c0_i32_0 = arith.constant 0 : i32
    %c0_i32_1 = arith.constant 0 : i32
    return %c0_i32, %c0_i32_0 : i32, i32
  }
  func.func @transform_9(%arg0: i32, %arg1: i32) -> (i32, i32) {
    %c0_i32 = arith.constant 0 : i32
    %c0_i32_0 = arith.constant 0 : i32
    %c0_i32_1 = arith.constant 0 : i32
    return %c0_i32, %c0_i32_0 : i32, i32
  }
  func.func @transform_10(%arg0: i32, %arg1: i32) -> (i32, i32, i32) {
    %c0_i32 = arith.constant 0 : i32
    %c0_i32_0 = arith.constant 0 : i32
    return %arg0, %arg1, %c0_i32 : i32, i32, i32
  }
}

</mosaic_0001>

<bundles_post_ra>
// kernel: tpu_custom_call.1
= control target key start
LH: loop header
LB: loop body
LE: loop exit
PB: predicated region body
PF: predicated region fallthrough
CT: control target
= control target key end

     0   :  { %15 = vsyncpa [#allocation6], 0  ;;  %s1314_s0 = inlined_call_operand.hbm [shape: f32[2,8,32], index: 0, kind: input, shape index: {}]   ;;  %s1315_s1 = inlined_call_operand.hbm [shape: f32[2,8,32], index: 1, kind: input, shape index: {}]   ;;  %s1316_s2 = inlined_call_operand.hbm [shape: bf16[32,32], index: 2, kind: input, shape index: {}]   ;;  %s1317_s3 = inlined_call_operand.vmem [shape: f32[1,32], index: 3, kind: input, shape index: {}]   ;;  %s1318_s4 = inlined_call_operand.hbm [shape: bf16[32,32], index: 4, kind: input, shape index: {}]   ;;  %s1319_s5 = inlined_call_operand.vmem [shape: f32[1,32], index: 5, kind: input, shape index: {}]   ;;  %s1320_s6 = inlined_call_operand.hbm [shape: bf16[32,32], index: 6, kind: input, shape index: {}]   ;;  %s1321_s7 = inlined_call_operand.vmem [shape: f32[1,32], index: 7, kind: input, shape index: {}]   ;;  %s1322_s8 = inlined_call_operand.hbm [shape: bf16[32,32], index: 8, kind: input, shape index: {}]   ;;  %s1323_s9 = inlined_call_operand.vmem [shape: f32[1,32], index: 9, kind: input, shape index: {}]   ;;  %s1324_s10 = inlined_call_operand.hbm [shape: f32[2,8,32], index: 10, kind: output, shape index: {}]  }
   0x1   :  { %16 = vsyncpa [#allocation9], 0 }
   0x2   :  { %17 = vsyncpa [#allocation12], 0 }
   0x3   :  { %18 = vsyncpa [#allocation15], 0 }
   0x4   :  { %19 = vsyncpa [#allocation7], 0  ;;  %s37_s15 = sshll.u32 %s1315_s1, 4  ;;  %s1111_s16 = smov [#allocation8]   ;;  %s38_s15 = int_to_ptr.hbm [resolvable:$true] %s37_s15 }
   0x5   :  { %s39_s17 = sshll.u32 %s1111_s16, 4  ;;  %s1112_s18 = smov 128   ;;  %s40_s17 = int_to_ptr.vmem [resolvable:$true] %s39_s17 }
   0x6   :  { %s1113_s19 = smov 8   ;;  %s65_s22 = sshll.u32 %s1318_s4, 4  ;;  %s66_s22 = int_to_ptr.hbm [resolvable:$true] %s65_s22 }
   0x7   :  { %45 = dma.hbm_to_vmem [thread:$0]  %s38_s15, 256, %s40_s17, [#allocation9], %s1112_s18, %s1112_s18, %s1113_s19  }
   0x8   :  { %s1114_s23 = smov [#allocation11]   ;;  %s24_s1 = sshll.u32 %s1314_s0, 4  ;;  %s25_s1 = int_to_ptr.hbm [resolvable:$true] %s24_s1 }
   0x9   :  { %s67_s24 = sshll.u32 %s1114_s23, 4  ;;  %s1115_s27 = smov 64   ;;  %s68_s24 = int_to_ptr.vmem [resolvable:$true] %s67_s24 }
   0xa   :  { %s1116_s28 = smov 4   ;;  %s50_s11 = sshll.u32 %s1316_s2, 4  ;;  %s51_s11 = int_to_ptr.hbm [resolvable:$true] %s50_s11 }
   0xb   :  { %73 = dma.hbm_to_vmem [thread:$0]  %s66_s22, 256, %s68_s24, [#allocation12], %s1115_s27, %s1115_s27, %s1116_s28  }
   0xc   :  { %s1117_s12 = smov [#allocation5]   ;;  %s1118_s4 = smov [#allocation10]  }
   0xd   :  { %s26_s13 = sshll.u32 %s1117_s12, 4  ;;  %s52_s14 = sshll.u32 %s1118_s4, 4  ;;  %s27_s13 = int_to_ptr.vmem [resolvable:$true] %s26_s13  ;;  %s53_s14 = int_to_ptr.vmem [resolvable:$true] %s52_s14 }
   0xe   :  { %32 = dma.hbm_to_vmem [thread:$0]  %s25_s1, 256, %s27_s13, [#allocation6], %s1112_s18, %s1112_s18, %s1113_s19  }
   0xf   :  { %s80_s16 = sshll.u32 %s1320_s6, 4  ;;  %s95_s2 = sshll.u32 %s1322_s8, 4  ;;  %s81_s16 = int_to_ptr.hbm [resolvable:$true] %s80_s16  ;;  %s96_s2 = int_to_ptr.hbm [resolvable:$true] %s95_s2 }
  0x10   :  { %58 = dma.hbm_to_vmem [thread:$0]  %s51_s11, 256, %s53_s14, [#allocation9], %s1115_s27, %s1115_s27, %s1116_s28  }
  0x11   :  { %s1119_s21 = smov [#allocation13]   ;;  %s1120_s23 = smov [#allocation14]  }
  0x12   :  { %s82_s22 = sshll.u32 %s1119_s21, 4  ;;  %s97_s24 = sshll.u32 %s1120_s23, 4  ;;  %s83_s22 = int_to_ptr.vmem [resolvable:$true] %s82_s22  ;;  %s98_s24 = int_to_ptr.vmem [resolvable:$true] %s97_s24 }
  0x13   :  { %88 = dma.hbm_to_vmem [thread:$0]  %s81_s16, 256, %s83_s22, [#allocation12], %s1115_s27, %s1115_s27, %s1116_s28  }
  0x14   :  { %103 = dma.hbm_to_vmem [thread:$0]  %s96_s2, 256, %s98_s24, [#allocation15], %s1115_s27, %s1115_s27, %s1116_s28  }
  0x15   :  { %1101 = dma.done.wait [#allocation6], 256  }
  0x16   :  { %1102 = vsyncadd [#allocation6], 4294967040 }
  0x17   :  { %1103 = dma.done.wait [#allocation9], 512  }
  0x18   :  { %1104 = vsyncadd [#allocation9], 4294966784 }
  0x19   :  { %1105 = dma.done.wait [#allocation12], 512  }
  0x1a   :  { %1106 = vsyncadd [#allocation12], 4294966784 }
  0x1b   :  { %1107 = dma.done.wait [#allocation15], 256  }
  0x1c   :  { %1108 = vsyncadd [#allocation15], 4294967040  ;;  %v874_v0 = vld [vmem:[#allocation11 + $0x8] sm:$0xff]  ;;  %v878_v1 = vld [vmem:[#allocation10 + $0x8] sm:$0xff]  ;;  %vm158_vm0 = vcmask 261120   ;;  %vm212_vm1 = vcmask 257024  }
  0x1d   :  { %v873_v2 = vld [vmem:[#allocation11] sm:$0xff]  ;;  %v877_v3 = vld [vmem:[#allocation10] sm:$0xff]  ;;  %v136_v5 = vld [vmem:[#allocation8 + $0x8] sm:$0xff]  ;;  %168 = vmatpush.bf16.msra.mxu0 %v874_v0  ;;  %252 = vmatpush.bf16.msra.mxu2 %v878_v1  ;;  %vm266_vm2 = vcmask 64512   ;;  %vm330_vm3 = vcmask 1043456   ;;  %s1124_s28 = smov 16  }
  0x1e   :  { %v135_v4 = vld [vmem:[#allocation8] sm:$0xff]  ;;  %v219_v6 = vld [vmem:[#allocation5] sm:$0xff]  ;;  %v220_v7 = vld [vmem:[#allocation5 + $0x8] sm:$0xff]  ;;  %s1125_s29 = smov 24   ;;  %vm508_vm4 = vcmask 130112   ;;  %vm631_vm5 = vcmask 195712  }
  0x1f   :  { %v876_v8 = vld [vmem:[#allocation13 + $0x8] sm:$0xff]  ;;  %v875_v9 = vld [vmem:[#allocation13] sm:$0xff]  ;;  %v137_v10 = vpack.c.bf16 %v136_v5, %v135_v4  ;;  %v221_v11 = vpack.c.bf16 %v220_v7, %v219_v6  ;;  %vm754_vm6 = vcmask 261312   ;;  %s1126_s12 = smov [#allocation16]   ;;  %s805_s0 = sshll.u32 %s1324_s10, 4  ;;  %s806_s0 = int_to_ptr.hbm [resolvable:$true] %s805_s0 }
  0x20   :  { %202 = vmatpush.bf16.msra.mxu1 %v876_v8  ;;  %v897_v12 = vld [vmem:[%s1319_s5] ss:$0 sm:$0xff]  ;;  %s1122_s5 = smov 112   ;;  %s803_s13 = sshll.u32 %s1126_s12, 4  ;;  %s804_s13 = int_to_ptr.vmem [resolvable:$true] %s803_s13 }
  0x21   :  { %169 = vmatpush.bf16.msra.mxu0 %v873_v2  ;;  %253 = vmatpush.bf16.msra.mxu2 %v877_v3  ;;  %v898_v16 = vld [vmem:[%s1317_s3] ss:$0 sm:$0xff]  ;;  %s1121_s3 = smov 120  }
  0x22   :  { %v899_v22 = vld [vmem:[%s1321_s7] ss:$0 sm:$0xff]  ;;  %s1123_s7 = smov 104  }
  0x24   :  { %203 = vmatpush.bf16.msra.mxu1 %v875_v9  ;;  %829 = vmatmul.msk.bf16.vlgmr.msra.gmra.mxu0 %vm158_vm0, %v137_v10 }
  0x25   :  { %847 = vmatmul.msk.bf16.vlgmr.msra.gmra.mxu2 %vm158_vm0, %v221_v11 }
  0x27   :  { %838 = vmatmul.msk.bf16.vlgmr.msra.gmra.mxu1 %vm158_vm0, %v137_v10 }
  0xa1   :  { %v171_v13 = vpop.f32.mrf.mxu0 }
  0xa2   :  { %v172_v14 = vadd.f32 %v897_v12, %v171_v13 }
  0xa4   :  { %v210_v15 = vpack.c.bf16 %v172_v14, %v172_v14  ;;  %v205_v23 = vpop.f32.mrf.mxu1 }
  0xa5   :  { %v206_v26 = vadd.f32 %v899_v22, %v205_v23 }
  0xa6   :  { %213 = vst.msk [vmem:[#allocation2] sm:$0xf] %vm212_vm1, %v210_v15 }
  0xa7   :  { %v215_v31 = vpack.c.bf16 %v206_v26, %v206_v26 }
  0xa8   :  { %v255_v17 = vpop.f32.mrf.mxu2 }
  0xa9   :  { %v256_v18 = vadd.f32 %v898_v16, %v255_v17  ;;  %v173_v19 = vpop.f32.mrf.mxu0  ;;  %217 = vst.msk [vmem:[#allocation3] sm:$0xf] %vm212_vm1, %v215_v31 }
  0xaa   :  { %v174_v21 = vadd.f32 %v897_v12, %v173_v19 }
  0xab   :  { %v260_v20 = vpack.c.bf16 %v256_v18, %v256_v18 }
  0xac   :  { %v211_v25 = vpack.c.bf16 %v174_v21, %v174_v21  ;;  %v207_v36 = vpop.f32.mrf.mxu1 }
  0xad   :  { %v371_v24 = vunpack.c.l.b16 %v260_v20  ;;  %v262_v27 = vld [vmem:[#allocation2] sm:$0xf]  ;;  %v208_v37 = vadd.f32 %v899_v22, %v207_v36 }
  0xae   :  { %214 = vst.msk [vmem:[#allocation2 + $0x4] sm:$0xf] %vm212_vm1, %v211_v25  ;;  %v271_v29 = vsel %vm266_vm2, %v262_v27, 0  ;;  %v376_v30 = vunpack.c.l.b16 %v262_v27 }
  0xaf   :  { %v372_v28 = vpack.c.b16 %v371_v24, %v371_v24  ;;  %280 = vmatpush.bf16.xpose.msra.mxu3 %v271_v29  ;;  %v216_v40 = vpack.c.bf16 %v208_v37, %v208_v37 }
  0xb0   :  { %v257_v32 = vpop.f32.mrf.mxu2  ;;  %v377_v34 = vpack.c.b16 %v376_v30, %v376_v30  ;;  %v264_v59 = vld [vmem:[#allocation3] sm:$0xf] }
  0xb1   :  { %v258_v33 = vadd.f32 %v898_v16, %v257_v32  ;;  %373 = vrot.lane.b32.xlu1 %v372_v28, %s1121_s3  ;;  %218 = vst.msk [vmem:[#allocation3 + $0x4] sm:$0xf] %vm212_vm1, %v216_v40  ;;  %v451_v60 = vunpack.c.l.b16 %v264_v59  ;;  %v332_v0 = vsel %vm330_vm3, %v264_v59, 0 }
  0xb2   :  { %513 = vrot.lane.b32.xlu2 %v377_v34, %s1122_s5  ;;  %378 = vrot.lane.b32.xlu0 %v377_v34, %s1121_s3 }
  0xb3   :  { %v261_v35 = vpack.c.bf16 %v258_v33, %v258_v33  ;;  %v1249_v63 = vpack.c.b16 %v451_v60, %v451_v60  ;;  %341 = vmatpush.bf16.msrb.mxu1 %v332_v0 }
  0xb5   :  { %v400_v38 = vunpack.c.l.b16 %v261_v35  ;;  %v263_v39 = vld [vmem:[#allocation2 + $0x4] sm:$0xf] }
  0xb6   :  { %848 = vmatmul.msk.bf16.vlgmr.msra.gmra.mxu3 %vm266_vm2, %v260_v20  ;;  %v290_v42 = vsel %vm266_vm2, %v263_v39, 0  ;;  %v405_v43 = vunpack.c.l.b16 %v263_v39 }
  0xb7   :  { %v401_v41 = vpack.c.b16 %v400_v38, %v400_v38  ;;  %299 = vmatpush.bf16.xpose.msrb.mxu0 %v290_v42 }
  0xb8   :  { %v406_v44 = vpack.c.b16 %v405_v43, %v405_v43  ;;  %v265_v45 = vld [vmem:[#allocation3 + $0x4] sm:$0xf] }
  0xb9   :  { %402 = vrot.lane.b32.xlu1 %v401_v41, %s1121_s3  ;;  %v475_v46 = vunpack.c.l.b16 %v265_v45  ;;  %v351_v1 = vsel %vm330_vm3, %v265_v45, 0 }
  0xba   :  { %536 = vrot.lane.b32.xlu2 %v406_v44, %s1122_s5  ;;  %407 = vrot.lane.b32.xlu0 %v406_v44, %s1121_s3 }
  0xbb   :  { %v1238_v47 = vpack.c.b16 %v475_v46, %v475_v46  ;;  %360 = vmatpush.bf16.msrb.mxu2 %v351_v1 }
  0xbe   :  { %849 = vmatmul.msk.bf16.vlgmr.msrb.gmra.mxu0 %vm266_vm2, %v261_v35 }
  0xc1   :  { %534 = vrot.lane.b32.xlu1 %v401_v41, %s1122_s5 }
  0xc2   :  { %636 = vrot.lane.b32.xlu2 %v377_v34, %s1123_s7  ;;  %511 = vrot.lane.b32.xlu0 %v372_v28, %s1122_s5 }
  0xc9   :  { %634 = vrot.lane.b32.xlu1 %v372_v28, %s1123_s7 }
  0xca   :  { %657 = vrot.lane.b32.xlu2 %v401_v41, %s1123_s7  ;;  %659 = vrot.lane.b32.xlu0 %v406_v44, %s1123_s7 }
  0xd2   :  { %477 = vrot.lane.b32.xlu0 %v1238_v47, %s1121_s3  ;;  %579 = vrot.lane.b32.xlu2 %v1249_v63, %s1122_s5 }
 0x10c   :  { %v514_v48 = vpop.permute.xlu2 %513 }
 0x10d   :  { %v519_v52 = vsel %vm266_vm2, %v514_v48, 0 }
 0x114   :  { %v537_v49 = vpop.permute.xlu2 %536 }
 0x115   :  { %v542_v58 = vsel %vm266_vm2, %v537_v49, 0 }
 0x11c   :  { %v637_v53 = vpop.permute.xlu2 %636 }
 0x11d   :  { %v642_v56 = vsel %vm266_vm2, %v637_v53, 0 }
 0x123   :  { %v374_v54 = vpop.permute.xlu1 %373 }
 0x124   :  { %v379_v50 = vpop.permute.xlu0 %378  ;;  %v658_v12 = vpop.permute.xlu2 %657 }
 0x125   :  { %v384_v51 = vsel %vm266_vm2, %v379_v50, 0 }
 0x126   :  { %393 = vmatpush.bf16.xpose.msrb.mxu3 %v384_v51 }
 0x12b   :  { %v403_v61 = vpop.permute.xlu1 %402 }
 0x12c   :  { %v408_v55 = vpop.permute.xlu0 %407  ;;  %v580_v34 = vpop.permute.xlu2 %579 }
 0x12d   :  { %v413_v57 = vsel %vm266_vm2, %v408_v55, 0  ;;  %852 = vmatmul.msk.bf16.vlgmr.msrb.gmra.mxu3 %vm266_vm2, %v374_v54  ;;  %v585_v38 = vsel %vm330_vm3, %v580_v34, 0 }
 0x12e   :  { %528 = vmatpush.bf16.xpose.msra.mxu3 %v519_v52  ;;  %422 = vmatpush.bf16.xpose.msra.mxu0 %v413_v57 }
 0x133   :  { %v535_v9 = vpop.permute.xlu1 %534 }
 0x134   :  { %v512_v62 = vpop.permute.xlu0 %511 }
 0x135   :  { %853 = vmatmul.msk.bf16.vlgmr.msra.gmra.mxu0 %vm266_vm2, %v403_v61 }
 0x136   :  { %651 = vmatpush.bf16.xpose.msrb.mxu3 %v642_v56  ;;  %551 = vmatpush.bf16.xpose.msrb.mxu0 %v542_v58 }
 0x139   :  { %v282_v2 = vpop.f32.mrf.mxu3 }
 0x13a   :  { %v305_v3 = vsel %vm266_vm2, %v282_v2, -inf }
 0x13b   :  { %v301_v4 = vpop.f32.mrf.mxu0  ;;  %306 = vmax.xlane.f32.xlu1 %v305_v3  ;;  %v635_v11 = vpop.permute.xlu1 %634 }
 0x13c   :  { %v660_v5 = vpop.permute.xlu0 %659  ;;  %v308_v6 = vsel %vm266_vm2, %v301_v4, -inf }
 0x13d   :  { %v665_v7 = vsel %vm266_vm2, %v660_v5, 0  ;;  %309 = vmax.xlane.f32.xlu0 %v308_v6  ;;  %856 = vmatmul.msk.bf16.vlgmr.msra.gmra.mxu3 %vm266_vm2, %v512_v62 }
 0x13e   :  { %674 = vmatpush.bf16.xpose.msra.mxu0 %v665_v7 }
 0x141   :  { %v284_v8 = vpop.f32.mrf.mxu3 }
 0x143   :  { %v303_v10 = vpop.f32.mrf.mxu0 }
 0x144   :  { %v478_v13 = vpop.permute.xlu0 %477 }
 0x145   :  { %857 = vmatmul.msk.bf16.vlgmr.msrb.gmra.mxu0 %vm266_vm2, %v535_v9  ;;  %v483_v14 = vsel %vm330_vm3, %v478_v13, 0 }
 0x146   :  { %492 = vmatpush.bf16.msra.mxu2 %v483_v14 }
 0x14d   :  { %860 = vmatmul.msk.bf16.vlgmr.msrb.gmra.mxu3 %vm266_vm2, %v635_v11 }
 0x151   :  { %600 = vrot.lane.b32.xlu0 %v1238_v47, %s1122_s5 }
 0x154   :  { %453 = vrot.lane.b32.xlu1 %v1249_v63, %s1121_s3 }
 0x155   :  { %861 = vmatmul.msk.bf16.vlgmr.msra.gmra.mxu0 %vm266_vm2, %v658_v12 }
 0x1ae   :  { %v307_v15 = vpop.xlane.xlu1 %306 }
 0x1af   :  { %v311_v16 = vsub.f32 %v282_v2, %v307_v15 }
 0x1b0   :  { %v310_v17 = vpop.xlane.xlu0 %309  ;;  %v395_v18 = vpop.f32.mrf.mxu3 }
 0x1b1   :  { %v313_v19 = vmul.f32 1.442695, %v311_v16  ;;  %v312_v20 = vsub.f32 %v301_v4, %v310_v17  ;;  %v428_v21 = vsel %vm266_vm2, %v395_v18, -inf }
 0x1b2   :  { %v424_v22 = vpop.f32.mrf.mxu0  ;;  %429 = vmax.xlane.f32.xlu2 %v428_v21 }
 0x1b3   :  { %901 = vpow2.f32 %v313_v19  ;;  %v315_v23 = vmul.f32 1.442695, %v312_v20  ;;  %v431_v26 = vsel %vm266_vm2, %v424_v22, -inf }
 0x1b5   :  { %903 = vpow2.f32 %v315_v23 }
 0x1b8   :  { %v397_v24 = vpop.f32.mrf.mxu3 }
 0x1b9   :  { %v902_v25 = vpop.eup %901 }
 0x1ba   :  { %v426_v27 = vpop.f32.mrf.mxu0  ;;  %432 = vmax.xlane.f32.xlu2 %v431_v26  ;;  %v325_v28 = vpack.c.bf16 %v902_v25, %v902_v25  ;;  %v317_v49 = vsel %vm266_vm2, %v902_v25, 0.0 }
 0x1bb   :  { %v904_v29 = vpop.eup %903 }
 0x1bc   :  { %850 = vmatmul.msk.bf16.vlgmr.msrb.gmra.mxu1 %vm266_vm2, %v325_v28  ;;  %v326_v30 = vpack.c.bf16 %v904_v29, %v904_v29  ;;  %v320_v51 = vsel %vm266_vm2, %v904_v29, 0.0 }
 0x1be   :  { %851 = vmatmul.msk.bf16.vlgmr.msrb.gmra.mxu2 %vm266_vm2, %v326_v30 }
 0x1c0   :  { %v530_v31 = vpop.f32.mrf.mxu3 }
 0x1c1   :  { %v557_v32 = vsel %vm266_vm2, %v530_v31, -inf }
 0x1c2   :  { %v553_v33 = vpop.f32.mrf.mxu0  ;;  %558 = vmax.xlane.f32.xlu2 %v557_v32 }
 0x1c3   :  { %v601_v35 = vpop.permute.xlu0 %600  ;;  %v560_v41 = vsel %vm266_vm2, %v553_v33, -inf }
 0x1c4   :  { %v606_v36 = vsel %vm330_vm3, %v601_v35, 0 }
 0x1c5   :  { %615 = vmatpush.bf16.msrb.mxu2 %v606_v36 }
 0x1c6   :  { %v454_v37 = vpop.permute.xlu1 %453 }
 0x1c7   :  { %v459_v39 = vsel %vm330_vm3, %v454_v37, 0 }
 0x1c8   :  { %v532_v40 = vpop.f32.mrf.mxu3  ;;  %468 = vmatpush.bf16.msra.mxu1 %v459_v39 }
 0x1ca   :  { %v555_v42 = vpop.f32.mrf.mxu0  ;;  %561 = vmax.xlane.f32.xlu2 %v560_v41 }
 0x1cc   :  { %594 = vmatpush.bf16.msrb.mxu1 %v585_v38 }
 0x1d0   :  { %v653_v43 = vpop.f32.mrf.mxu3 }
 0x1d1   :  { %v680_v44 = vsel %vm266_vm2, %v653_v43, -inf }
 0x1d2   :  { %v676_v45 = vpop.f32.mrf.mxu0  ;;  %681 = vmax.xlane.f32.xlu0 %v680_v44 }
 0x1d3   :  { %v683_v46 = vsel %vm266_vm2, %v676_v45, -inf }
 0x1d4   :  { %684 = vmax.xlane.f32.xlu1 %v683_v46 }
 0x1d8   :  { %v655_v48 = vpop.f32.mrf.mxu3 }
 0x1da   :  { %v678_v50 = vpop.f32.mrf.mxu0  ;;  %318 = vadd.xlane.f32.xlu0 %v317_v49 }
 0x1dc   :  { %321 = vadd.xlane.f32.xlu1 %v320_v51 }
 0x1e2   :  { %723 = vrot.lane.b32.xlu2 %v1238_v47, %s1123_s7 }
 0x1ea   :  { %702 = vrot.lane.b32.xlu2 %v1249_v63, %s1123_s7 }
 0x225   :  { %v430_v52 = vpop.xlane.xlu2 %429 }
 0x226   :  { %v434_v53 = vsub.f32 %v395_v18, %v430_v52 }
 0x228   :  { %v436_v54 = vmul.f32 1.442695, %v434_v53 }
 0x22a   :  { %905 = vpow2.f32 %v436_v54 }
 0x22d   :  { %v433_v55 = vpop.xlane.xlu2 %432 }
 0x22e   :  { %v435_v56 = vsub.f32 %v424_v22, %v433_v55 }
 0x230   :  { %v906_v57 = vpop.eup %905  ;;  %v438_v58 = vmul.f32 1.442695, %v435_v56 }
 0x231   :  { %v448_v59 = vpack.c.bf16 %v906_v57, %v906_v57  ;;  %v440_v60 = vsel %vm266_vm2, %v906_v57, 0.0 }
 0x232   :  { %907 = vpow2.f32 %v438_v58  ;;  %441 = vadd.xlane.f32.xlu2 %v440_v60 }
 0x233   :  { %854 = vmatmul.msk.bf16.vlgmr.msra.gmra.mxu1 %vm266_vm2, %v448_v59 }
 0x235   :  { %v559_v61 = vpop.xlane.xlu2 %558 }
 0x236   :  { %v563_v47 = vsub.f32 %v530_v31, %v559_v61 }
 0x238   :  { %v908_v62 = vpop.eup %907  ;;  %v565_v0 = vmul.f32 1.442695, %v563_v47 }
 0x239   :  { %v449_v63 = vpack.c.bf16 %v908_v62, %v908_v62  ;;  %v343_v1 = vpop.f32.mrf.mxu1  ;;  %v443_v2 = vsel %vm266_vm2, %v908_v62, 0.0 }
 0x23a   :  { %909 = vpow2.f32 %v565_v0  ;;  %444 = vadd.xlane.f32.xlu1 %v443_v2 }
 0x23b   :  { %855 = vmatmul.msk.bf16.vlgmr.msra.gmra.mxu2 %vm266_vm2, %v449_v63 }
 0x23d   :  { %v562_v3 = vpop.xlane.xlu2 %561 }
 0x23e   :  { %v564_v4 = vsub.f32 %v553_v33, %v562_v3 }
 0x240   :  { %v910_v5 = vpop.eup %909  ;;  %v567_v6 = vmul.f32 1.442695, %v564_v4 }
 0x241   :  { %v577_v7 = vpack.c.bf16 %v910_v5, %v910_v5  ;;  %v345_v8 = vpop.f32.mrf.mxu1  ;;  %v362_v9 = vpop.f32.mrf.mxu2  ;;  %v569_v10 = vsel %vm266_vm2, %v910_v5, 0.0 }
 0x242   :  { %911 = vpow2.f32 %v567_v6  ;;  %570 = vadd.xlane.f32.xlu0 %v569_v10  ;;  %v880_v6 = vld [vmem:[#allocation14 + $0x8] sm:$0xff] }
 0x243   :  { %858 = vmatmul.msk.bf16.vlgmr.msrb.gmra.mxu1 %vm266_vm2, %v577_v7  ;;  %789 = vmatpush.bf16.msra.mxu3 %v880_v6  ;;  %v879_v7 = vld [vmem:[#allocation14] sm:$0xff] }
 0x245   :  { %v724_v11 = vpop.permute.xlu2 %723  ;;  %v682_v12 = vpop.xlane.xlu0 %681 }
 0x246   :  { %v729_v13 = vsel %vm330_vm3, %v724_v11, 0  ;;  %v686_v14 = vsub.f32 %v653_v43, %v682_v12 }
 0x247   :  { %v685_v15 = vpop.xlane.xlu1 %684  ;;  %738 = vmatpush.bf16.msra.mxu2 %v729_v13  ;;  %790 = vmatpush.bf16.msra.mxu3 %v879_v7 }
 0x248   :  { %v912_v16 = vpop.eup %911  ;;  %v688_v17 = vmul.f32 1.442695, %v686_v14  ;;  %v687_v18 = vsub.f32 %v676_v45, %v685_v15  ;;  %v900_v14 = vld [vmem:[%s1323_s9] ss:$0 sm:$0xff] }
 0x249   :  { %v578_v19 = vpack.c.bf16 %v912_v16, %v912_v16  ;;  %v364_v20 = vpop.f32.mrf.mxu2  ;;  %v572_v21 = vsel %vm266_vm2, %v912_v16, 0.0 }
 0x24a   :  { %913 = vpow2.f32 %v688_v17  ;;  %v690_v22 = vmul.f32 1.442695, %v687_v18  ;;  %573 = vadd.xlane.f32.xlu1 %v572_v21 }
 0x24b   :  { %859 = vmatmul.msk.bf16.vlgmr.msrb.gmra.mxu2 %vm266_vm2, %v578_v19 }
 0x24c   :  { %915 = vpow2.f32 %v690_v22 }
 0x24d   :  { %v703_v23 = vpop.permute.xlu2 %702  ;;  %v319_v24 = vpop.xlane.xlu0 %318 }
 0x24e   :  { %v708_v25 = vsel %vm330_vm3, %v703_v23, 0  ;;  %917 = vrcp.f32 %v319_v24 }
 0x24f   :  { %v322_v26 = vpop.xlane.xlu1 %321  ;;  %717 = vmatpush.bf16.msra.mxu1 %v708_v25 }
 0x250   :  { %v914_v27 = vpop.eup %913  ;;  %919 = vrcp.f32 %v322_v26 }
 0x251   :  { %v700_v28 = vpack.c.bf16 %v914_v27, %v914_v27  ;;  %v692_v29 = vsel %vm266_vm2, %v914_v27, 0.0 }
 0x252   :  { %v916_v30 = vpop.eup %915  ;;  %693 = vadd.xlane.f32.xlu0 %v692_v29 }
 0x253   :  { %862 = vmatmul.msk.bf16.vlgmr.msra.gmra.mxu1 %vm266_vm2, %v700_v28  ;;  %v695_v31 = vsel %vm266_vm2, %v916_v30, 0.0  ;;  %v701_v36 = vpack.c.bf16 %v916_v30, %v916_v30 }
 0x254   :  { %v918_v32 = vpop.eup %917  ;;  %696 = vadd.xlane.f32.xlu1 %v695_v31 }
 0x255   :  { %v366_v33 = vmul.f32 %v918_v32, %v343_v1 }
 0x256   :  { %v920_v34 = vpop.eup %919 }
 0x257   :  { %368 = vst.msk [vmem:[#allocation4] sm:$0xff] %vm266_vm2, %v366_v33  ;;  %v367_v35 = vmul.f32 %v920_v34, %v362_v9 }
 0x259   :  { %369 = vst.msk [vmem:[#allocation4 + $0x8] sm:$0xff] %vm266_vm2, %v367_v35 }
 0x25b   :  { %863 = vmatmul.msk.bf16.vlgmr.msra.gmra.mxu2 %vm266_vm2, %v701_v36 }
 0x2a5   :  { %v442_v37 = vpop.xlane.xlu2 %441 }
 0x2a6   :  { %921 = vrcp.f32 %v442_v37 }
 0x2ac   :  { %v922_v38 = vpop.eup %921 }
 0x2ad   :  { %v445_v41 = vpop.xlane.xlu1 %444 }
 0x2ae   :  { %923 = vrcp.f32 %v445_v41 }
 0x2b0   :  { %v470_v39 = vpop.f32.mrf.mxu1 }
 0x2b1   :  { %v498_v40 = vmul.f32 %v922_v38, %v470_v39 }
 0x2b3   :  { %502 = vrot.lane.b32.xlu0 %v498_v40, %s1113_s19 }
 0x2b4   :  { %v924_v44 = vpop.eup %923 }
 0x2b5   :  { %v571_v42 = vpop.xlane.xlu0 %570 }
 0x2b6   :  { %925 = vrcp.f32 %v571_v42 }
 0x2b8   :  { %v472_v43 = vpop.f32.mrf.mxu1 }
 0x2bc   :  { %v926_v48 = vpop.eup %925 }
 0x2bd   :  { %v574_v51 = vpop.xlane.xlu1 %573 }
 0x2be   :  { %v494_v45 = vpop.f32.mrf.mxu2  ;;  %927 = vrcp.f32 %v574_v51 }
 0x2bf   :  { %v499_v46 = vmul.f32 %v924_v44, %v494_v45 }
 0x2c0   :  { %v596_v49 = vpop.f32.mrf.mxu1 }
 0x2c1   :  { %v621_v50 = vmul.f32 %v926_v48, %v596_v49  ;;  %504 = vrot.lane.b32.xlu1 %v499_v46, %s1113_s19 }
 0x2c3   :  { %625 = vrot.lane.b32.xlu2 %v621_v50, %s1124_s28 }
 0x2c4   :  { %v928_v55 = vpop.eup %927 }
 0x2c5   :  { %v694_v54 = vpop.xlane.xlu0 %693 }
 0x2c6   :  { %v496_v52 = vpop.f32.mrf.mxu2  ;;  %929 = vrcp.f32 %v694_v54 }
 0x2c7   :  { %v697_v59 = vpop.xlane.xlu1 %696 }
 0x2c8   :  { %v598_v53 = vpop.f32.mrf.mxu1  ;;  %931 = vrcp.f32 %v697_v59 }
 0x2cc   :  { %v930_v60 = vpop.eup %929 }
 0x2ce   :  { %v617_v56 = vpop.f32.mrf.mxu2  ;;  %v932_v0 = vpop.eup %931 }
 0x2cf   :  { %v622_v57 = vmul.f32 %v928_v55, %v617_v56 }
 0x2d0   :  { %v719_v58 = vpop.f32.mrf.mxu1 }
 0x2d1   :  { %627 = vrot.lane.b32.xlu0 %v622_v57, %s1124_s28  ;;  %v744_v47 = vmul.f32 %v930_v60, %v719_v58 }
 0x2d6   :  { %v619_v61 = vpop.f32.mrf.mxu2 }
 0x2d8   :  { %v721_v62 = vpop.f32.mrf.mxu1 }
 0x2d9   :  { %748 = vrot.lane.b32.xlu0 %v744_v47, %s1125_s29 }
 0x2de   :  { %v740_v63 = vpop.f32.mrf.mxu2 }
 0x2df   :  { %v745_v1 = vmul.f32 %v932_v0, %v740_v63 }
 0x2e1   :  { %750 = vrot.lane.b32.xlu1 %v745_v1, %s1125_s29 }
 0x2e6   :  { %v742_v2 = vpop.f32.mrf.mxu2 }
 0x31d   :  { %v626_v4 = vpop.permute.xlu2 %625 }
 0x325   :  { %v503_v3 = vpop.permute.xlu0 %502 }
 0x326   :  { %509 = vst.msk [vmem:[#allocation4] sm:$0xff] %vm508_vm4, %v503_v3 }
 0x327   :  { %632 = vst.msk [vmem:[#allocation4] sm:$0xff] %vm631_vm5, %v626_v4 }
 0x333   :  { %v505_v5 = vpop.permute.xlu1 %504 }
 0x334   :  { %510 = vst.msk [vmem:[#allocation4 + $0x8] sm:$0xff] %vm508_vm4, %v505_v5 }
 0x343   :  { %v628_v8 = vpop.permute.xlu0 %627 }
 0x344   :  { %633 = vst.msk [vmem:[#allocation4 + $0x8] sm:$0xff] %vm631_vm5, %v628_v8 }
 0x34b   :  { %v749_v9 = vpop.permute.xlu0 %748 }
 0x34c   :  { %755 = vst.msk [vmem:[#allocation4] sm:$0xff] %vm754_vm6, %v749_v9 }
 0x353   :  { %v751_v10 = vpop.permute.xlu1 %750  ;;  %v757_v11 = vld [vmem:[#allocation4] sm:$0xff] }
 0x354   :  { %756 = vst.msk [vmem:[#allocation4 + $0x8] sm:$0xff] %vm754_vm6, %v751_v10 }
 0x35b   :  { %v758_v12 = vld [vmem:[#allocation4 + $0x8] sm:$0xff] }
 0x35c   :  { %v759_v13 = vpack.c.bf16 %v758_v12, %v757_v11 }
 0x35e   :  { %872 = vmatmul.msk.bf16.vlgmr.msra.gmra.mxu3 %vm158_vm0, %v759_v13 }
 0x3e1   :  { %v792_v15 = vpop.f32.mrf.mxu3 }
 0x3e2   :  { %v793_v16 = vadd.f32 %v900_v14, %v792_v15 }
 0x3e4   :  { %797 = vst.msk [vmem:[#allocation16] sm:$0xff] %vm158_vm0, %v793_v16 }
 0x3e9   :  { %v794_v17 = vpop.f32.mrf.mxu3 }
 0x3ea   :  { %v795_v18 = vadd.f32 %v900_v14, %v794_v17 }
 0x3ec   :  { %798 = vst.msk [vmem:[#allocation16 + $0x8] sm:$0xff] %vm158_vm0, %v795_v18 }
 0x3ed   :  { %811 = dma.vmem_to_hbm [thread:$0]  %s804_s13, 256, %s806_s0, [#allocation7], %s1112_s18, %s1112_s18, %s1113_s19  }
 0x3ee   :  { %1109 = dma.done.wait [#allocation7], 256  }
 0x3ef   :  { %1110 = vsyncadd [#allocation7], 4294967040 }
 0x3f0   :  { %816 = vsyncpa [#allocation6], 1 }
 0x3f1   :  { %817 = vsyncpa [#allocation9], 1 }
 0x3f2   :  { %818 = vsyncpa [#allocation12], 1 }
 0x3f3   :  { %819 = vsyncpa [#allocation15], 1 }
 0x3f4   :  { %820 = vsyncpa [#allocation7], 1 }

</bundles_post_ra>
